<compile_context>
chip_gen: v6e
topology: v6e:2x2x1
jax: 0.10.0
libtpu: 0.0.40
codegen_flags: <defaults>
</compile_context>

<pallas_src>
import functools

import jax
import jax.numpy as jnp
from jax import lax
from jax.experimental import pallas as pl
from jax.experimental.pallas import tpu as pltpu

KSIZE = 4
STRIDE = 2
PAD = 1
BN_EPS = 1e-5
LANES = 128


def _round_up(x, m):
    return ((x + m - 1) // m) * m


# --------------------------------------------------------------------------- kernels
def _conv_stats_kernel(p_ref, w_ref, y_ref, part_ref):
    # p_ref    : (TILE_M, CKK_PAD)   bf16 im2col patch tile
    # w_ref    : (CKK_PAD, COUT_PAD) bf16 reshaped conv weight (zero padded)
    # y_ref    : (TILE_M, COUT_PAD)  f32 conv output tile (pre-BN)
    # part_ref : (1, 8, COUT_PAD)    f32 per-tile partial stats (row0=sum, row1=sumsq)
    y = jnp.dot(p_ref[...], w_ref[...], preferred_element_type=jnp.float32)
    y_ref[...] = y
    s1 = jnp.sum(y, axis=0, keepdims=True)          # per-channel sum       (1, COUT_PAD)
    s2 = jnp.sum(y * y, axis=0, keepdims=True)      # per-channel sum-of-sq (1, COUT_PAD)
    fill = jnp.zeros((6, y.shape[1]), jnp.float32)  # pad sublane dim to 8
    part_ref[...] = jnp.concatenate([s1, s2, fill], axis=0)[None]


def _bn_relu_kernel(ss_ref, y_ref, o_ref):
    # ss_ref : (8, COUT_PAD) f32 — row0 = scale (gamma*rsqrt(var+eps)), row1 = shift
    # y_ref  : (TILE_M, COUT_PAD) f32 conv output tile
    # o_ref  : (TILE_M, COUT_PAD) f32 normalized + ReLU'd output tile
    scale = ss_ref[0:1, :]
    shift = ss_ref[1:2, :]
    o_ref[...] = jnp.maximum(y_ref[...] * scale + shift, 0.0)


# --------------------------------------------------------------------------- wrapper
def cell_forward(x, conv_w, conv_b, bn_gamma, bn_beta, *, tile_m=512, interpret=False):
    """x: (N, Cin, H, W) NCHW.  conv_w: (Cout, Cin, K, K).  Returns (N, Cout, Ho, Wo)."""
    # Train-mode BatchNorm subtracts the per-channel batch mean, which cancels a
    # constant conv bias exactly — so conv_b is intentionally not used in the kernel.
    del conv_b

    n, cin, h, w = x.shape
    cout = conv_w.shape[0]
    ho = (h + 2 * PAD - KSIZE) // STRIDE + 1
    wo = (w + 2 * PAD - KSIZE) // STRIDE + 1
    m = n * ho * wo
    ckk = cin * KSIZE * KSIZE

    ckk_p = _round_up(ckk, LANES)     # lane-dense / MXU-K-friendly contraction dim
    cout_p = _round_up(cout, LANES)   # lane-dense output channels (unmasked stores)
    tile_m = _round_up(max(1, min(tile_m, m)), 8)
    m_p = _round_up(m, tile_m)
    n_tiles = m_p // tile_m

    # im2col, fused by XLA (identity grouped conv) — patch columns ordered (Cin, kh, kw),
    # which matches conv_w.reshape(Cout, Cin*K*K).
    patches = lax.conv_general_dilated_patches(
        x, (KSIZE, KSIZE), (STRIDE, STRIDE), [(PAD, PAD), (PAD, PAD)],
        dimension_numbers=("NCHW", "OIHW", "NHWC"))          # (N, Ho, Wo, Cin*K*K)
    patches = patches.reshape(m, ckk)
    # Zero padding keeps BN statistics exact (padded rows contribute 0 to sum / sumsq).
    patches = jnp.pad(patches, ((0, m_p - m), (0, ckk_p - ckk))).astype(jnp.bfloat16)

    w2d = conv_w.reshape(cout, ckk).T                         # (Cin*K*K, Cout)
    w2d = jnp.pad(w2d, ((0, ckk_p - ckk), (0, cout_p - cout))).astype(jnp.bfloat16)

    vmem_limit = 32 * 1024 * 1024
    cost1 = pl.CostEstimate(
        flops=2 * m_p * ckk_p * cout_p,
        transcendentals=0,
        bytes_accessed=patches.size * 2 + w2d.size * 2 + m_p * cout_p * 4)

    # ---- pass 1: conv matmul + per-tile partial BN statistics -------------------
    y2d, parts = pl.pallas_call(
        _conv_stats_kernel,
        out_shape=(jax.ShapeDtypeStruct((m_p, cout_p), jnp.float32),
                   jax.ShapeDtypeStruct((n_tiles, 8, cout_p), jnp.float32)),
        grid_spec=pltpu.PrefetchScalarGridSpec(
            num_scalar_prefetch=0,
            grid=(n_tiles,),
            in_specs=[pl.BlockSpec((tile_m, ckk_p), lambda i: (i, 0)),
                      pl.BlockSpec((ckk_p, cout_p), lambda i: (0, 0))],
            out_specs=(pl.BlockSpec((tile_m, cout_p), lambda i: (i, 0)),
                       pl.BlockSpec((1, 8, cout_p), lambda i: (i, 0, 0)))),
        compiler_params=pltpu.CompilerParams(
            dimension_semantics=("parallel",),      # independent tiles -> megacore OK
            vmem_limit_bytes=vmem_limit),
        cost_estimate=cost1,
        interpret=interpret,
    )(patches, w2d)

    # ---- finalize batch statistics (tiny, fp32, plain JAX) ----------------------
    sums = jnp.sum(parts[:, 0, :], axis=0)
    sqs = jnp.sum(parts[:, 1, :], axis=0)
    mean = sums / m
    var = sqs / m - mean * mean                 # biased variance == PyTorch train-mode BN
    inv = lax.rsqrt(var + BN_EPS)
    gamma_p = jnp.pad(bn_gamma.astype(jnp.float32), (0, cout_p - cout))
    beta_p = jnp.pad(bn_beta.astype(jnp.float32), (0, cout_p - cout))
    scale = gamma_p * inv
    shift = beta_p - mean * scale
    ss = jnp.zeros((8, cout_p), jnp.float32).at[0].set(scale).at[1].set(shift)

    # ---- pass 2: normalize + ReLU -----------------------------------------------
    out2d = pl.pallas_call(
        _bn_relu_kernel,
        out_shape=jax.ShapeDtypeStruct((m_p, cout_p), jnp.float32),
        grid_spec=pltpu.PrefetchScalarGridSpec(
            num_scalar_prefetch=0,
            grid=(n_tiles,),
            in_specs=[pl.BlockSpec((8, cout_p), lambda i: (0, 0)),
                      pl.BlockSpec((tile_m, cout_p), lambda i: (i, 0))],
            out_specs=pl.BlockSpec((tile_m, cout_p), lambda i: (i, 0))),
        compiler_params=pltpu.CompilerParams(
            dimension_semantics=("parallel",),
            vmem_limit_bytes=vmem_limit),
        interpret=interpret,
    )(ss, y2d)

    # slice off padding; return NCHW to match the PyTorch module's contract.
    out = out2d[:m, :cout].reshape(n, ho, wo, cout)
    return out.transpose(0, 3, 1, 2)


# --------------------------------------------------------------------------- reference
def _reference(x, conv_w, conv_b, bn_gamma, bn_beta):
    y = lax.conv_general_dilated(
        x, conv_w, (STRIDE, STRIDE), [(PAD, PAD), (PAD, PAD)],
        dimension_numbers=("NCHW", "OIHW", "NCHW"))
    y = y + conv_b[None, :, None, None]
    mean = y.mean(axis=(0, 2, 3), keepdims=True)
    var = ((y - mean) ** 2).mean(axis=(0, 2, 3), keepdims=True)
    y = (y - mean) * lax.rsqrt(var + BN_EPS)
    y = y * bn_gamma[None, :, None, None] + bn_beta[None, :, None, None]
    return jnp.maximum(y, 0.0)


if __name__ == "__main__":
    key = jax.random.PRNGKey(0)
    k_x, k_w, k_b = jax.random.split(key, 3)

    N, CIN, COUT, H, W = 2, 4, 8, 16, 16

    x = jax.random.normal(k_x, (N, CIN, H, W), dtype=jnp.float32)
    conv_w = 0.1 * jax.random.normal(k_w, (COUT, CIN, KSIZE, KSIZE), dtype=jnp.float32)
    conv_b = 0.01 * jax.random.normal(k_b, (COUT,), dtype=jnp.float32)
    bn_gamma = jnp.ones((COUT,), dtype=jnp.float32)
    bn_beta = jnp.zeros((COUT,), dtype=jnp.float32)

    # tile_m=64 -> M=128 splits into 2 grid steps, exercising the multi-tile BN path.
    fwd = jax.jit(functools.partial(cell_forward, tile_m=64))
    out = fwd(x, conv_w, conv_b, bn_gamma, bn_beta)
    jax.block_until_ready(out)
    assert out.shape == (N, COUT, H // 2, W // 2), out.shape

    ref = _reference(x, conv_w, conv_b, bn_gamma, bn_beta)
    err = float(jnp.max(jnp.abs(out - ref)))
    assert err < 7.5e-2, f"max abs error {err}"  # bf16 MXU operands, fp32 accumulation

    print("KERNEL_OK")
</pallas_src>

<mosaic_0001>
module attributes {stable_mosaic.version = 11 : i64} {
  func.func @_conv_stats_kernel(%arg0: i32, %arg1: memref<64x128xbf16, #tpu.memory_space<vmem>>, %arg2: memref<128x128xbf16, #tpu.memory_space<vmem>>, %arg3: memref<64x128xf32, #tpu.memory_space<vmem>>, %arg4: memref<1x8x128xf32, #tpu.memory_space<vmem>>) attributes {dimension_semantics = [#tpu.dimension_semantics<parallel>], iteration_bounds = array<i64: 2>, scalar_prefetch = 0 : i64, scratch_operands = 0 : i64, tpu.core_type = #tpu.core_type<tc>, window_params = [{transform_indices = @transform_0, window_bounds = array<i64: 64, 128>}, {pipeline_mode = #tpu.pipeline_mode<synchronous>, transform_indices = @transform_1, window_bounds = array<i64: 128, 128>}, {transform_indices = @transform_2, window_bounds = array<i64: 64, 128>}, {transform_indices = @transform_3, window_bounds = array<i64: 1, 8, 128>}]} {
    %c0 = arith.constant 0 : index
    %c0_0 = arith.constant 0 : index
    %0 = vector.load %arg1[%c0, %c0_0] : memref<64x128xbf16, #tpu.memory_space<vmem>>, vector<64x128xbf16>
    %c0_1 = arith.constant 0 : index
    %c0_2 = arith.constant 0 : index
    %1 = vector.load %arg2[%c0_1, %c0_2] : memref<128x128xbf16, #tpu.memory_space<vmem>>, vector<128x128xbf16>
    %cst = arith.constant dense<0.000000e+00> : vector<64x128xf32>
    %2 = tpu.matmul %0, %1, %cst {dimension_numbers = #tpu.dot_dimension_numbers<[1], [0], [0], [1], [0, 0, 1, 1], [], []>} : vector<64x128xbf16>, vector<128x128xbf16>, vector<64x128xf32> -> vector<64x128xf32>
    %c0_3 = arith.constant 0 : index
    %c0_4 = arith.constant 0 : index
    %3 = vector.load %arg3[%c0_3, %c0_4] : memref<64x128xf32, #tpu.memory_space<vmem>>, vector<64x128xf32>
    tpu.vector_store %arg3[%c0_3, %c0_4], %2 {strides = array<i32>} : memref<64x128xf32, #tpu.memory_space<vmem>>, vector<64x128xf32>,
    %cst_5 = arith.constant dense<0.000000e+00> : vector<128xf32>
    %4 = vector.multi_reduction <add>, %2, %cst_5 [0] : vector<64x128xf32> to vector<128xf32>
    %5 = vector.shape_cast %4 : vector<128xf32> to vector<1x128xf32>
    %6 = arith.mulf %2, %2 : vector<64x128xf32>
    %cst_6 = arith.constant dense<0.000000e+00> : vector<128xf32>
    %7 = vector.multi_reduction <add>, %6, %cst_6 [0] : vector<64x128xf32> to vector<128xf32>
    %8 = vector.shape_cast %7 : vector<128xf32> to vector<1x128xf32>
    %cst_7 = arith.constant 0.000000e+00 : f32
    %9 = vector.broadcast %cst_7 : f32 to vector<6x128xf32>
    %10 = tpu.concatenate %5, %8, %9 in 0 : vector<1x128xf32>, vector<1x128xf32>, vector<6x128xf32> -> vector<8x128xf32>
    %11 = vector.shape_cast %10 : vector<8x128xf32> to vector<1x8x128xf32>
    %c0_8 = arith.constant 0 : index
    %c0_9 = arith.constant 0 : index
    %c0_10 = arith.constant 0 : index
    %12 = vector.load %arg4[%c0_8, %c0_9, %c0_10] : memref<1x8x128xf32, #tpu.memory_space<vmem>>, vector<1x8x128xf32>
    tpu.vector_store %arg4[%c0_8, %c0_9, %c0_10], %11 {strides = array<i32>} : memref<1x8x128xf32, #tpu.memory_space<vmem>>, vector<1x8x128xf32>,
    return
  }
  func.func @transform_0(%arg0: i32) -> (i32, i32) {
    %c0_i32 = arith.constant 0 : i32
    %c0_i32_0 = arith.constant 0 : i32
    return %arg0, %c0_i32 : i32, i32
  }
  func.func @transform_1(%arg0: i32) -> (i32, i32) {
    %c0_i32 = arith.constant 0 : i32
    %c0_i32_0 = arith.constant 0 : i32
    %c0_i32_1 = arith.constant 0 : i32
    return %c0_i32, %c0_i32_0 : i32, i32
  }
  func.func @transform_2(%arg0: i32) -> (i32, i32) {
    %c0_i32 = arith.constant 0 : i32
    %c0_i32_0 = arith.constant 0 : i32
    return %arg0, %c0_i32 : i32, i32
  }
  func.func @transform_3(%arg0: i32) -> (i32, i32, i32) {
    %c0_i32 = arith.constant 0 : i32
    %c0_i32_0 = arith.constant 0 : i32
    %c0_i32_1 = arith.constant 0 : i32
    return %arg0, %c0_i32, %c0_i32_0 : i32, i32, i32
  }
}

module attributes {stable_mosaic.version = 11 : i64} {
  func.func @_bn_relu_kernel(%arg0: i32, %arg1: memref<8x128xf32, #tpu.memory_space<vmem>>, %arg2: memref<64x128xf32, #tpu.memory_space<vmem>>, %arg3: memref<64x128xf32, #tpu.memory_space<vmem>>) attributes {dimension_semantics = [#tpu.dimension_semantics<parallel>], iteration_bounds = array<i64: 2>, scalar_prefetch = 0 : i64, scratch_operands = 0 : i64, tpu.core_type = #tpu.core_type<tc>, window_params = [{pipeline_mode = #tpu.pipeline_mode<synchronous>, transform_indices = @transform_0, window_bounds = array<i64: 8, 128>}, {transform_indices = @transform_1, window_bounds = array<i64: 64, 128>}, {transform_indices = @transform_2, window_bounds = array<i64: 64, 128>}]} {
    %c0 = arith.constant 0 : index
    %c0_0 = arith.constant 0 : index
    %0 = vector.load %arg1[%c0, %c0_0] : memref<8x128xf32, #tpu.memory_space<vmem>>, vector<1x128xf32>
    %c1 = arith.constant 1 : index
    %c0_1 = arith.constant 0 : index
    %1 = vector.load %arg1[%c1, %c0_1] : memref<8x128xf32, #tpu.memory_space<vmem>>, vector<1x128xf32>
    %c0_2 = arith.constant 0 : index
    %c0_3 = arith.constant 0 : index
    %2 = vector.load %arg2[%c0_2, %c0_3] : memref<64x128xf32, #tpu.memory_space<vmem>>, vector<64x128xf32>
    %3 = vector.broadcast %0 : vector<1x128xf32> to vector<64x128xf32>
    %4 = arith.mulf %2, %3 : vector<64x128xf32>
    %5 = vector.broadcast %1 : vector<1x128xf32> to vector<64x128xf32>
    %6 = arith.addf %4, %5 : vector<64x128xf32>
    %cst = arith.constant 0.000000e+00 : f32
    %7 = vector.broadcast %cst : f32 to vector<64x128xf32>
    %8 = arith.maximumf %6, %7 : vector<64x128xf32>
    %c0_4 = arith.constant 0 : index
    %c0_5 = arith.constant 0 : index
    %9 = vector.load %arg3[%c0_4, %c0_5] : memref<64x128xf32, #tpu.memory_space<vmem>>, vector<64x128xf32>
    tpu.vector_store %arg3[%c0_4, %c0_5], %8 {strides = array<i32>} : memref<64x128xf32, #tpu.memory_space<vmem>>, vector<64x128xf32>,
    return
  }
  func.func @transform_0(%arg0: i32) -> (i32, i32) {
    %c0_i32 = arith.constant 0 : i32
    %c0_i32_0 = arith.constant 0 : i32
    %c0_i32_1 = arith.constant 0 : i32
    return %c0_i32, %c0_i32_0 : i32, i32
  }
  func.func @transform_1(%arg0: i32) -> (i32, i32) {
    %c0_i32 = arith.constant 0 : i32
    %c0_i32_0 = arith.constant 0 : i32
    return %arg0, %c0_i32 : i32, i32
  }
  func.func @transform_2(%arg0: i32) -> (i32, i32) {
    %c0_i32 = arith.constant 0 : i32
    %c0_i32_0 = arith.constant 0 : i32
    return %arg0, %c0_i32 : i32, i32
  }
}

</mosaic_0001>

<bundles_post_ra>
// kernel: cell_forward.3
= control target key start
LH: loop header
LB: loop body
LE: loop exit
PB: predicated region body
PF: predicated region fallthrough
CT: control target
= control target key end

     0   :  { %s297_s9 = smov 0   ;;  %s320_s0 = inlined_call_operand.vmem [shape: f32[8,128], index: 0, kind: input, shape index: {}]   ;;  %s321_s1 = inlined_call_operand.vmem [shape: f32[128,128], index: 1, kind: input, shape index: {}]   ;;  %s322_s2 = inlined_call_operand.vmem [shape: f32[128,128], index: 2, kind: output, shape index: {}]  }
   0x1 LB: > { %s253_s10 = sadd.s32 4294967295, %s280_s9   ;;  %p257_p0 = scmp.ge.s32.totalorder %s280_s9, 1  ;;  %s280_s9 = sphi %s297_s9, %s12_s9  }
   0x2   : > { %p113_p1 = scmp.lt.s32.totalorder %s280_s9, 3 }
   0x4   : > { %p114_p2 = pnand %p257_p0, %p113_p1 }
   0x5   : > { %s258_s11 = sshll.u32 (!%p114_p2), %s253_s10, 3 }
   0x6   : > { %117 = sbr.rel (%p114_p2) target bundleno = 25 (0x19), region = 28  ;;  %p136_p3 = scmp.lt.s32.totalorder (!%p114_p2), %s258_s11, 15 }
   0xb   : > { %s324_s11 = smov (!%p136_p3, %s258_s11), 15  ;;  %v262_v0 = vld [vmem:[%s320_s0] ss:$0 sm:$0xff]  ;;  %v263_v1 = vld [vmem:[%s320_s0 + $0x1] ss:$0 sm:$0xff] }
   0xc   : > { %s259_s12 = sshll.u32 %s324_s11, 3 }
   0xd   : > { %s139_s17 = scalar_lea.vmem %s321_s1, %s259_s12  ;;  %s145_s22 = scalar_lea.vmem %s322_s2, %s259_s12 }
   0xe   : > { %v149_v2 = vld [vmem:[%s139_s17] sm:$0xff]  ;;  %v150_v3 = vld [vmem:[%s139_s17 + $0x8] sm:$0xff]  ;;  %v151_v4 = vld [vmem:[%s139_s17 + $0x10] sm:$0xff] }
   0xf   : > { %v161_v5 = vmul.f32 %v262_v0, %v149_v2  ;;  %v162_v6 = vmul.f32 %v262_v0, %v150_v3  ;;  %v163_v7 = vmul.f32 %v262_v0, %v151_v4  ;;  %v152_v8 = vld [vmem:[%s139_s17 + $0x18] sm:$0xff]  ;;  %v153_v9 = vld [vmem:[%s139_s17 + $0x20] sm:$0xff]  ;;  %v154_v10 = vld [vmem:[%s139_s17 + $0x28] sm:$0xff] }
  0x10   : > { %v164_v11 = vmul.f32 %v262_v0, %v152_v8  ;;  %v165_v12 = vmul.f32 %v262_v0, %v153_v9  ;;  %v166_v13 = vmul.f32 %v262_v0, %v154_v10  ;;  %v155_v14 = vld [vmem:[%s139_s17 + $0x30] sm:$0xff]  ;;  %v156_v15 = vld [vmem:[%s139_s17 + $0x38] sm:$0xff] }
  0x11   : > { %v173_v16 = vadd.f32 %v263_v1, %v161_v5  ;;  %v174_v17 = vadd.f32 %v263_v1, %v162_v6  ;;  %v175_v18 = vadd.f32 %v263_v1, %v163_v7  ;;  %v167_v19 = vmul.f32 %v262_v0, %v155_v14 }
  0x12   : > { %v176_v20 = vadd.f32 %v263_v1, %v164_v11  ;;  %v177_v21 = vadd.f32 %v263_v1, %v165_v12  ;;  %v178_v22 = vadd.f32 %v263_v1, %v166_v13  ;;  %v168_v23 = vmul.f32 %v262_v0, %v156_v15 }
  0x13   : > { %v181_v24 = vmax.f32 %v173_v16, 0.0  ;;  %v182_v25 = vmax.f32 %v174_v17, 0.0  ;;  %v183_v26 = vmax.f32 %v175_v18, 0.0  ;;  %v179_v27 = vadd.f32 %v263_v1, %v167_v19 }
  0x14   : > { %v184_v28 = vmax.f32 %v176_v20, 0.0  ;;  %v185_v29 = vmax.f32 %v177_v21, 0.0  ;;  %v186_v30 = vmax.f32 %v178_v22, 0.0  ;;  %v180_v31 = vadd.f32 %v263_v1, %v168_v23 }
  0x15   : > { %189 = vst [vmem:[%s145_s22] sm:$0xff] %v181_v24  ;;  %190 = vst [vmem:[%s145_s22 + $0x8] sm:$0xff] %v182_v25  ;;  %v187_v32 = vmax.f32 %v179_v27, 0.0 }
  0x16   : > { %191 = vst [vmem:[%s145_s22 + $0x10] sm:$0xff] %v183_v26  ;;  %192 = vst [vmem:[%s145_s22 + $0x18] sm:$0xff] %v184_v28  ;;  %v188_v33 = vmax.f32 %v180_v31, 0.0 }
  0x17   : > { %193 = vst [vmem:[%s145_s22 + $0x20] sm:$0xff] %v185_v29  ;;  %194 = vst [vmem:[%s145_s22 + $0x28] sm:$0xff] %v186_v30 }
  0x18   : > { %195 = vst [vmem:[%s145_s22 + $0x30] sm:$0xff] %v187_v32  ;;  %196 = vst [vmem:[%s145_s22 + $0x38] sm:$0xff] %v188_v33 }
  0x19 PF: > { %s12_s9 = sadd.s32 1, %s280_s9  }
  0x1a   : > { %p9_p4 = scmp.ge.s32.totalorder %s12_s9, 4  }
  0x1c   :  { %11 = sbr.rel (!%p9_p4) target bundleno = 1 (0x1), region = 58 }

// kernel: cell_forward.2
= control target key start
LH: loop header
LB: loop body
LE: loop exit
PB: predicated region body
PF: predicated region fallthrough
CT: control target
= control target key end

     0   :  { %s605_s12 = smov 0   ;;  %s664_s0 = inlined_call_operand.vmem [shape: bf16[128,128], index: 0, kind: input, shape index: {}]   ;;  %s665_s1 = inlined_call_operand.vmem [shape: bf16[128,128], index: 1, kind: input, shape index: {}]   ;;  %s666_s2 = inlined_call_operand.vmem [shape: f32[128,128], index: 2, kind: output, shape index: {0}]   ;;  %s667_s3 = inlined_call_operand.vmem [shape: f32[2,8,128], index: 3, kind: output, shape index: {1}]  }
   0x1 LB: > { %s611_s13 = sadd.s32 4294967295, %s583_s12   ;;  %p485_p0 = scmp.ge.s32.totalorder %s583_s12, 1  ;;  %s583_s12 = sphi %s605_s12, %s14_s12  }
   0x2   : > { %p141_p1 = scmp.lt.s32.totalorder %s583_s12, 3 }
   0x4   : > { %p142_p2 = pnand %p485_p0, %p141_p1 }
   0x5   : > { %s486_s16 = sshll.u32 (!%p142_p2), %s611_s13, 3  ;;  %p181_p4 = scmp.lt.s32.totalorder (!%p142_p2), %s611_s13, 1 }
   0x6   : > { %145 = sbr.rel (%p142_p2) target bundleno = 274 (0x112), region = 28  ;;  %p170_p3 = scmp.lt.s32.totalorder (!%p142_p2), %s486_s16, 15 }
   0xb   : > { %v565_v0 = vld [vmem:[%s665_s1 + $0x38] sm:$0xff]   ;;  %v566_v1 = vld [vmem:[%s665_s1 + $0x30] sm:$0xff]   ;;  %s669_s16 = smov (!%p170_p3, %s486_s16), 15  ;;  %v567_v2 = vld [vmem:[%s665_s1 + $0x28] sm:$0xff]   ;;  %s671_s13 = smov (!%p181_p4, %s611_s13), 1  ;;  %vm389_vm0 = vcmask 1040384  }
   0xc   : > { %517 = vmatprep.subr.bf16.mxu0 %v565_v0  ;;  %541 = vmatprep.subr.bf16.mxu1 %v565_v0  ;;  %s487_s21 = sshll.u32 %s669_s16, 2  ;;  %v568_v3 = vld [vmem:[%s665_s1 + $0x20] sm:$0xff]   ;;  %v569_v6 = vld [vmem:[%s665_s1 + $0x18] sm:$0xff]   ;;  %v570_v7 = vld [vmem:[%s665_s1 + $0x10] sm:$0xff]   ;;  %s489_s8 = sshll.u32 %s669_s16, 3  ;;  %vm391_vm1 = vcmask 1041408  }
   0xd   : > { %518 = vmatpush3.bf16.msra.mxu0 %v565_v0  ;;  %549 = vmatpush3.bf16.msra.mxu1 %v565_v0  ;;  %s631_s24 = scalar_lea.vmem %s664_s0, %s487_s21  ;;  %v571_v8 = vld [vmem:[%s665_s1 + $0x8] sm:$0xff]   ;;  %v572_v9 = vld [vmem:[%s665_s1] sm:$0xff]   ;;  %s179_s11 = scalar_lea.vmem %s666_s2, %s489_s8 }
   0xe   : > { %519 = vmatprep.subr.bf16.mxu0 %v566_v1  ;;  %542 = vmatprep.subr.bf16.mxu1 %v566_v1  ;;  %v573_v4 = vld [vmem:[%s631_s24] sm:$0xff]   ;;  %v575_v5 = vld [vmem:[%s631_s24 + $0x10] sm:$0xff]   ;;  %v574_v10 = vld [vmem:[%s631_s24 + $0x8] sm:$0xff]   ;;  %s490_s14 = sshll.u32 %s671_s13, 3 }
   0xf   : > { %533 = vmatprep.mubr.bf16.mxu0 %v573_v4  ;;  %537 = vmatprep.mubr.bf16.mxu1 %v575_v5  ;;  %v576_v11 = vld [vmem:[%s631_s24 + $0x18] sm:$0xff]   ;;  %s184_s17 = scalar_lea.vmem %s667_s3, %s490_s14 }
  0x11   : > { %520 = vmatpush3.bf16.msra.mxu0 %v566_v1  ;;  %550 = vmatpush3.bf16.msra.mxu1 %v566_v1 }
  0x12   : > { %521 = vmatprep.subr.bf16.mxu0 %v567_v2  ;;  %543 = vmatprep.subr.bf16.mxu1 %v567_v2 }
  0x15   : > { %522 = vmatpush3.bf16.msra.mxu0 %v567_v2  ;;  %551 = vmatpush3.bf16.msra.mxu1 %v567_v2 }
  0x16   : > { %523 = vmatprep.subr.bf16.mxu0 %v568_v3  ;;  %544 = vmatprep.subr.bf16.mxu1 %v568_v3 }
  0x19   : > { %524 = vmatpush3.bf16.msra.mxu0 %v568_v3  ;;  %552 = vmatpush3.bf16.msra.mxu1 %v568_v3 }
  0x1a   : > { %525 = vmatprep.subr.bf16.mxu0 %v569_v6  ;;  %545 = vmatprep.subr.bf16.mxu1 %v569_v6 }
  0x1d   : > { %526 = vmatpush3.bf16.msra.mxu0 %v569_v6  ;;  %553 = vmatpush3.bf16.msra.mxu1 %v569_v6 }
  0x1e   : > { %527 = vmatprep.subr.bf16.mxu0 %v570_v7  ;;  %546 = vmatprep.subr.bf16.mxu1 %v570_v7 }
  0x21   : > { %528 = vmatpush3.bf16.msra.mxu0 %v570_v7  ;;  %554 = vmatpush3.bf16.msra.mxu1 %v570_v7 }
  0x22   : > { %529 = vmatprep.subr.bf16.mxu0 %v571_v8  ;;  %547 = vmatprep.subr.bf16.mxu1 %v571_v8 }
  0x25   : > { %530 = vmatpush3.bf16.msra.mxu0 %v571_v8  ;;  %555 = vmatpush3.bf16.msra.mxu1 %v571_v8 }
  0x26   : > { %531 = vmatprep.subr.bf16.mxu0 %v572_v9  ;;  %548 = vmatprep.subr.bf16.mxu1 %v572_v9 }
  0x29   : > { %532 = vmatpush3.bf16.msra.mxu0 %v572_v9  ;;  %556 = vmatpush3.bf16.msra.mxu1 %v572_v9 }
  0x2c   : > { %534 = vmatmul.mubr.bf16.vlgmr.msra.gmra.mxu0 %v574_v10  ;;  %538 = vmatmul.mubr.bf16.vlgmr.msra.gmra.mxu1 %v576_v11 }
  0xec   : > { %v535_v12 = vpop.f32.mrf.mxu0  ;;  %v539_v13 = vpop.f32.mrf.mxu1 }
  0xed   : > { %349 = vst [vmem:[%s179_s11 + $0x10] sm:$0xff] %v535_v12  ;;  %353 = vst [vmem:[%s179_s11 + $0x30] sm:$0xff] %v539_v13  ;;  %v370_v23 = vmul.f32 %v535_v12, %v535_v12  ;;  %v374_v35 = vmul.f32 %v539_v13, %v539_v13 }
  0xee   : > { %v316_v14 = vpop.f32.mrf.mxu0  ;;  %v332_v15 = vpop.f32.mrf.mxu1 }
  0xef   : > { %347 = vst [vmem:[%s179_s11] sm:$0xff] %v316_v14  ;;  %351 = vst [vmem:[%s179_s11 + $0x20] sm:$0xff] %v332_v15  ;;  %v368_v20 = vmul.f32 %v316_v14, %v316_v14  ;;  %v372_v29 = vmul.f32 %v332_v15, %v332_v15 }
  0xf0   : > { %v536_v16 = vpop.f32.mrf.mxu0  ;;  %v540_v17 = vpop.f32.mrf.mxu1 }
  0xf1   : > { %350 = vst [vmem:[%s179_s11 + $0x18] sm:$0xff] %v536_v16  ;;  %354 = vst [vmem:[%s179_s11 + $0x38] sm:$0xff] %v540_v17  ;;  %v371_v26 = vmul.f32 %v536_v16, %v536_v16  ;;  %v375_v38 = vmul.f32 %v540_v17, %v540_v17 }
  0xf2   : > { %v319_v18 = vpop.f32.mrf.mxu0  ;;  %v335_v19 = vpop.f32.mrf.mxu1 }
  0xf3   : > { %348 = vst [vmem:[%s179_s11 + $0x8] sm:$0xff] %v319_v18  ;;  %v355_v21 = vadd.f32 %v319_v18, %v316_v14  ;;  %v369_v22 = vmul.f32 %v319_v18, %v319_v18  ;;  %352 = vst [vmem:[%s179_s11 + $0x28] sm:$0xff] %v335_v19  ;;  %v373_v33 = vmul.f32 %v335_v19, %v335_v19 }
  0xf5   : > { %v356_v24 = vadd.f32 %v535_v12, %v355_v21  ;;  %v376_v25 = vadd.f32 %v369_v22, %v368_v20 }
  0xf7   : > { %v377_v27 = vadd.f32 %v376_v25, %v370_v23  ;;  %v357_v28 = vadd.f32 %v536_v16, %v356_v24 }
  0xf9   : > { %v358_v30 = vadd.f32 %v357_v28, %v332_v15  ;;  %v378_v31 = vadd.f32 %v377_v27, %v371_v26 }
  0xfb   : > { %v359_v32 = vadd.f32 %v358_v30, %v335_v19  ;;  %v379_v34 = vadd.f32 %v378_v31, %v372_v29 }
  0xfd   : > { %v360_v36 = vadd.f32 %v539_v13, %v359_v32  ;;  %v380_v37 = vadd.f32 %v379_v34, %v373_v33 }
  0xff   : > { %v361_v39 = vadd.f32 %v540_v17, %v360_v36  ;;  %v381_v40 = vadd.f32 %v380_v37, %v374_v35 }
 0x101   : > { %v362_v41 = vrot.slane %v361_v39, 4  ;;  %v382_v42 = vadd.f32 %v381_v40, %v375_v38 }
 0x103   : > { %v363_v43 = vadd.f32 %v362_v41, %v361_v39  ;;  %v383_v44 = vrot.slane %v382_v42, 4 }
 0x105   : > { %v364_v45 = vrot.slane %v363_v43, 2  ;;  %v384_v46 = vadd.f32 %v383_v44, %v382_v42 }
 0x107   : > { %v365_v47 = vadd.f32 %v364_v45, %v363_v43  ;;  %v385_v48 = vrot.slane %v384_v46, 2 }
 0x109   : > { %v366_v49 = vrot.slane %v365_v47, 1  ;;  %v386_v50 = vadd.f32 %v385_v48, %v384_v46 }
 0x10b   : > { %v387_v51 = vrot.slane %v386_v50, 1  ;;  %v367_v52 = vadd.f32 %v366_v49, %v365_v47 }
 0x10d   : > { %v388_v53 = vadd.f32 %v387_v51, %v386_v50 }
 0x10f   : > { %v390_v54 = vsel %vm389_vm0, %v367_v52, %v388_v53 }
 0x110   : > { %v392_v55 = vsel %vm391_vm1, %v390_v54, 0.0 }
 0x111   : > { %393 = vst [vmem:[%s184_s17] sm:$0xff] %v392_v55 }
 0x112 PF: > { %s14_s12 = sadd.s32 1, %s583_s12  }
 0x113   : > { %p11_p5 = scmp.ge.s32.totalorder %s14_s12, 4  }
 0x115   :  { %13 = sbr.rel (!%p11_p5) target bundleno = 1 (0x1), region = 70 }

</bundles_post_ra>
